<compile_context>
chip_gen: v5e
topology: v5e:2x2
jax: 0.10.0
libtpu: 0.0.40
codegen_flags: <defaults>
</compile_context>

<pallas_src>
import jax
import jax.numpy as jnp
from jax.experimental import pallas as pl
from jax.experimental.pallas import tpu as pltpu

_LANE = 128   # lane width (hidden-dim padding target for the resident weights)
_SUBLANE = 8  # sublane width: batch tile must be a multiple of this (f32)


def _round_up(n, m):
    return (n + m - 1) // m * m


def _mlp_kernel(x_ref, w1_ref, b1_ref, w2_ref, b2_ref, o_ref):
    # Layer 1: Linear + ReLU.  x is cast to the matmul dtype in-kernel (VPU),
    # MXU accumulates in f32, bias add / ReLU stay f32 on the VPU.
    x = x_ref[...].astype(w1_ref.dtype)
    h = jnp.dot(x, w1_ref[...], preferred_element_type=jnp.float32)
    h = jnp.maximum(h + b1_ref[...], 0.0)

    # TODO(synk): nn.Dropout(0.2) is identity in eval mode; training-mode dropout
    # would need pltpu.prng_seed (seeded per pl.program_id(0)) + pltpu.prng_random_bits
    # to build the keep mask and a 1/(1-p) rescale.

    # Layer 2: Linear + ReLU.  NOTE: in the bf16 path the f32 layer-1 activations
    # are cast to bf16 before the second matmul (extra, small precision loss).
    o = jnp.dot(h.astype(w2_ref.dtype), w2_ref[...],
                preferred_element_type=jnp.float32)
    o = jnp.maximum(o + b2_ref[...], 0.0)
    o_ref[...] = o.astype(o_ref.dtype)


def prepare_mlp_params(w1, b1, w2, b2, matmul_dtype=jnp.bfloat16):
    """One-time weight prep (hoisted out of the per-step forward call).

    Weights are [in, out] (transposed vs. nn.Linear), biases [out] or [1, out].
    Only the hidden dim is zero-padded to a lane multiple (weights are tiny and
    stay VMEM-resident); zero-padded rows/cols keep the math exact.  Weights are
    cast to `matmul_dtype` (bf16 by default -> bf16 MXU path); biases stay f32.
    """
    n_in, n_hid = w1.shape
    n_out = w2.shape[1]
    n_hid_p = _round_up(n_hid, _LANE)

    w1p = jnp.pad(w1.astype(matmul_dtype), ((0, 0), (0, n_hid_p - n_hid)))
    b1p = jnp.pad(jnp.reshape(b1, (1, n_hid)).astype(jnp.float32),
                  ((0, 0), (0, n_hid_p - n_hid)))
    w2p = jnp.pad(w2.astype(matmul_dtype), ((0, n_hid_p - n_hid), (0, 0)))
    b2p = jnp.reshape(b2, (1, n_out)).astype(jnp.float32)
    return w1p, b1p, w2p, b2p


def mlp_forward(x, params, *, block_batch=2048):
    """Fused 3-layer MLP forward: x [B, n_input] -> [B, n_output].

    `params` comes from `prepare_mlp_params` (padded/cast once, reused every
    ponder step).  `block_batch` rows are processed per grid step.
    """
    w1p, b1p, w2p, b2p = params
    B, n_in = x.shape
    n_in_w, n_hid_p = w1p.shape
    n_out = w2p.shape[1]
    assert n_in == n_in_w, "x feature dim must match prepared w1"
    out_dtype = x.dtype

    # Balanced batch tiles: tb multiple of 8, sized from cdiv(B, n_steps) to
    # minimize edge-block waste.  Edge blocks are write-masked (no batch pad).
    tb = min(block_batch, _round_up(B, _SUBLANE))
    n_steps = pl.cdiv(B, tb)
    tb = min(tb, _round_up(pl.cdiv(B, n_steps), _SUBLANE))
    grid = (pl.cdiv(B, tb),)

    itemsize = lambda a: a.size * a.dtype.itemsize
    cost = pl.CostEstimate(
        flops=2 * B * (n_in * n_hid_p + n_hid_p * n_out),
        transcendentals=0,
        bytes_accessed=(B * n_in * x.dtype.itemsize
                        + itemsize(w1p) + itemsize(b1p)
                        + itemsize(w2p) + itemsize(b2p)
                        + B * n_out * jnp.dtype(out_dtype).itemsize),
    )

    # Resident VMEM budget: double-buffered x/out tiles + weights + layer-1 acts.
    vmem_needed = (2 * tb * (n_in + n_out) * x.dtype.itemsize
                   + itemsize(w1p) + itemsize(b1p) + itemsize(w2p) + itemsize(b2p)
                   + tb * n_hid_p * 4)
    compiler_kwargs = {}
    if vmem_needed > 12 * 1024 * 1024:  # beyond v5e's 16 MiB default scoped VMEM
        compiler_kwargs["vmem_limit_bytes"] = min(int(vmem_needed * 2), 100 << 20)

    out = pl.pallas_call(
        _mlp_kernel,
        out_shape=jax.ShapeDtypeStruct((B, n_out), out_dtype),
        grid=grid,
        in_specs=[
            # x: one batch tile per grid step (pipelined), true feature width.
            pl.BlockSpec((tb, n_in), lambda i: (i, 0)),
            # Weights / biases: constant block index -> VMEM-resident across steps.
            pl.BlockSpec((n_in, n_hid_p), lambda i: (0, 0)),
            pl.BlockSpec((1, n_hid_p), lambda i: (0, 0)),
            pl.BlockSpec((n_hid_p, n_out), lambda i: (0, 0)),
            pl.BlockSpec((1, n_out), lambda i: (0, 0)),
        ],
        out_specs=pl.BlockSpec((tb, n_out), lambda i: (i, 0)),
        compiler_params=pltpu.CompilerParams(
            dimension_semantics=("parallel",),  # shard batch tiles across TCs (v7x)
            **compiler_kwargs,
        ),
        cost_estimate=cost,
    )(x, w1p, b1p, w2p, b2p)

    return out


def init_linear_params(key, n_in, n_out, dtype=jnp.float32):
    """Deterministic init matching nn.Linear's U(-1/sqrt(n_in), 1/sqrt(n_in)).

    Returned weight is transposed to [n_in, n_out] for the kernel layout.
    """
    k_w, k_b = jax.random.split(key)
    bound = 1.0 / jnp.sqrt(float(n_in))
    w = jax.random.uniform(k_w, (n_in, n_out), dtype, minval=-bound, maxval=bound)
    b = jax.random.uniform(k_b, (1, n_out), dtype, minval=-bound, maxval=bound)
    return w, b


def _reference(x, w1, b1, w2, b2):
    # High-precision f32 reference (eval-mode dropout = identity).
    hp = jax.lax.Precision.HIGHEST
    h = jnp.maximum(jnp.dot(x, w1, precision=hp) + b1, 0.0)
    return jnp.maximum(jnp.dot(h, w2, precision=hp) + b2, 0.0)


if __name__ == "__main__":
    # Small, module-consistent shapes.
    n_input, n_hidden, n_output = 16, 32, 8

    key = jax.random.PRNGKey(0)
    k_x, k_l1, k_l2, k_xb = jax.random.split(key, 4)

    w1, b1 = init_linear_params(k_l1, n_input, n_hidden)
    w2, b2 = init_linear_params(k_l2, n_hidden, n_output)

    # Weight prep is hoisted: done once, reused every forward call.
    params_f32 = prepare_mlp_params(w1, b1, w2, b2, matmul_dtype=jnp.float32)
    params_bf16 = prepare_mlp_params(w1, b1, w2, b2)  # default bf16 MXU path

    # 1) Tiny batch (single grid step), f32 end to end.
    x = jax.random.normal(k_x, (8, n_input), jnp.float32)
    out = jax.block_until_ready(mlp_forward(x, params_f32))
    ref = _reference(x, w1, b1, w2, b2)
    assert out.shape == (8, n_output)
    assert jnp.allclose(out, ref, atol=1e-4, rtol=1e-4)

    # 2) Larger, non-multiple batch exercising the multi-step grid with
    #    write-masked edge blocks (B=200, block_batch=64 -> tb=56, grid of 4).
    xb = jax.random.normal(k_xb, (200, n_input), jnp.float32)
    out_b = jax.block_until_ready(mlp_forward(xb, params_f32, block_batch=64))
    ref_b = _reference(xb, w1, b1, w2, b2)
    assert out_b.shape == (200, n_output)
    assert jnp.allclose(out_b, ref_b, atol=1e-4, rtol=1e-4)

    # 3) Default bf16 MXU path (weights cast once; f32 accumulation); looser tol.
    out_bf = jax.block_until_ready(mlp_forward(xb, params_bf16, block_batch=64))
    assert out_bf.shape == (200, n_output)
    assert jnp.allclose(out_bf, ref_b, atol=5e-2, rtol=5e-2)

    # 4) Default large block_batch path (single tile covering the whole batch).
    out_big = jax.block_until_ready(mlp_forward(xb, params_bf16))
    assert jnp.allclose(out_big, ref_b, atol=5e-2, rtol=5e-2)

    print("KERNEL_OK")
</pallas_src>

<mosaic_0001>
module attributes {stable_mosaic.version = 11 : i64} {
  func.func @_mlp_kernel(%arg0: i32, %arg1: memref<8x16xf32, #tpu.memory_space<vmem>>, %arg2: memref<16x128xf32, #tpu.memory_space<vmem>>, %arg3: memref<1x128xf32, #tpu.memory_space<vmem>>, %arg4: memref<128x8xf32, #tpu.memory_space<vmem>>, %arg5: memref<1x8xf32, #tpu.memory_space<vmem>>, %arg6: memref<8x8xf32, #tpu.memory_space<vmem>>) attributes {dimension_semantics = [#tpu.dimension_semantics<parallel>], iteration_bounds = array<i64: 1>, scalar_prefetch = 0 : i64, scratch_operands = 0 : i64, tpu.core_type = #tpu.core_type<tc>, window_params = [{transform_indices = @transform_0, window_bounds = array<i64: 8, 16>}, {pipeline_mode = #tpu.pipeline_mode<synchronous>, transform_indices = @transform_1, window_bounds = array<i64: 16, 128>}, {pipeline_mode = #tpu.pipeline_mode<synchronous>, transform_indices = @transform_2, window_bounds = array<i64: 1, 128>}, {pipeline_mode = #tpu.pipeline_mode<synchronous>, transform_indices = @transform_3, window_bounds = array<i64: 128, 8>}, {pipeline_mode = #tpu.pipeline_mode<synchronous>, transform_indices = @transform_4, window_bounds = array<i64: 1, 8>}, {transform_indices = @transform_5, window_bounds = array<i64: 8, 8>}]} {
    %c0 = arith.constant 0 : index
    %c0_0 = arith.constant 0 : index
    %0 = vector.load %arg1[%c0, %c0_0] : memref<8x16xf32, #tpu.memory_space<vmem>>, vector<8x16xf32>
    %c0_1 = arith.constant 0 : index
    %c0_2 = arith.constant 0 : index
    %1 = vector.load %arg2[%c0_1, %c0_2] : memref<16x128xf32, #tpu.memory_space<vmem>>, vector<16x128xf32>
    %cst = arith.constant dense<0.000000e+00> : vector<8x128xf32>
    %2 = tpu.matmul %0, %1, %cst {dimension_numbers = #tpu.dot_dimension_numbers<[1], [0], [0], [1], [0, 0, 1, 1], [], []>} : vector<8x16xf32>, vector<16x128xf32>, vector<8x128xf32> -> vector<8x128xf32>
    %c0_3 = arith.constant 0 : index
    %c0_4 = arith.constant 0 : index
    %3 = vector.load %arg3[%c0_3, %c0_4] : memref<1x128xf32, #tpu.memory_space<vmem>>, vector<1x128xf32>
    %4 = vector.broadcast %3 : vector<1x128xf32> to vector<8x128xf32>
    %5 = arith.addf %2, %4 : vector<8x128xf32>
    %cst_5 = arith.constant 0.000000e+00 : f32
    %6 = vector.broadcast %cst_5 : f32 to vector<8x128xf32>
    %7 = arith.maximumf %5, %6 : vector<8x128xf32>
    %c0_6 = arith.constant 0 : index
    %c0_7 = arith.constant 0 : index
    %8 = vector.load %arg4[%c0_6, %c0_7] : memref<128x8xf32, #tpu.memory_space<vmem>>, vector<128x8xf32>
    %cst_8 = arith.constant dense<0.000000e+00> : vector<8x8xf32>
    %9 = tpu.matmul %7, %8, %cst_8 {dimension_numbers = #tpu.dot_dimension_numbers<[1], [0], [0], [1], [0, 0, 1, 1], [], []>} : vector<8x128xf32>, vector<128x8xf32>, vector<8x8xf32> -> vector<8x8xf32>
    %c0_9 = arith.constant 0 : index
    %c0_10 = arith.constant 0 : index
    %10 = vector.load %arg5[%c0_9, %c0_10] : memref<1x8xf32, #tpu.memory_space<vmem>>, vector<1x8xf32>
    %11 = vector.broadcast %10 : vector<1x8xf32> to vector<8x8xf32>
    %12 = arith.addf %9, %11 : vector<8x8xf32>
    %cst_11 = arith.constant 0.000000e+00 : f32
    %13 = vector.broadcast %cst_11 : f32 to vector<8x8xf32>
    %14 = arith.maximumf %12, %13 : vector<8x8xf32>
    %c0_12 = arith.constant 0 : index
    %c0_13 = arith.constant 0 : index
    %15 = vector.load %arg6[%c0_12, %c0_13] : memref<8x8xf32, #tpu.memory_space<vmem>>, vector<8x8xf32>
    tpu.vector_store %arg6[%c0_12, %c0_13], %14 {strides = array<i32>} : memref<8x8xf32, #tpu.memory_space<vmem>>, vector<8x8xf32>,
    return
  }
  func.func @transform_0(%arg0: i32) -> (i32, i32) {
    %c0_i32 = arith.constant 0 : i32
    %c0_i32_0 = arith.constant 0 : i32
    return %arg0, %c0_i32 : i32, i32
  }
  func.func @transform_1(%arg0: i32) -> (i32, i32) {
    %c0_i32 = arith.constant 0 : i32
    %c0_i32_0 = arith.constant 0 : i32
    %c0_i32_1 = arith.constant 0 : i32
    return %c0_i32, %c0_i32_0 : i32, i32
  }
  func.func @transform_2(%arg0: i32) -> (i32, i32) {
    %c0_i32 = arith.constant 0 : i32
    %c0_i32_0 = arith.constant 0 : i32
    %c0_i32_1 = arith.constant 0 : i32
    return %c0_i32, %c0_i32_0 : i32, i32
  }
  func.func @transform_3(%arg0: i32) -> (i32, i32) {
    %c0_i32 = arith.constant 0 : i32
    %c0_i32_0 = arith.constant 0 : i32
    %c0_i32_1 = arith.constant 0 : i32
    return %c0_i32, %c0_i32_0 : i32, i32
  }
  func.func @transform_4(%arg0: i32) -> (i32, i32) {
    %c0_i32 = arith.constant 0 : i32
    %c0_i32_0 = arith.constant 0 : i32
    %c0_i32_1 = arith.constant 0 : i32
    return %c0_i32, %c0_i32_0 : i32, i32
  }
  func.func @transform_5(%arg0: i32) -> (i32, i32) {
    %c0_i32 = arith.constant 0 : i32
    %c0_i32_0 = arith.constant 0 : i32
    return %arg0, %c0_i32 : i32, i32
  }
}

</mosaic_0001>

<bundles_post_ra>
// kernel: tpu_custom_call.1
= control target key start
LH: loop header
LB: loop body
LE: loop exit
PB: predicated region body
PF: predicated region fallthrough
CT: control target
= control target key end

     0   :  { %vm28_vm0 = vcmask 130048   ;;  %s239_s0 = inlined_call_operand.vmem [shape: f32[8,16], index: 0, kind: input, shape index: {}]   ;;  %s240_s1 = inlined_call_operand.vmem [shape: f32[16,128], index: 1, kind: input, shape index: {}]   ;;  %s241_s2 = inlined_call_operand.vmem [shape: f32[1,128], index: 2, kind: input, shape index: {}]   ;;  %s242_s3 = inlined_call_operand.vmem [shape: f32[128,8], index: 3, kind: input, shape index: {}]   ;;  %s243_s4 = inlined_call_operand.vmem [shape: f32[1,8], index: 4, kind: input, shape index: {}]   ;;  %s244_s5 = inlined_call_operand.hbm [shape: f32[8,8], index: 5, kind: output, shape index: {}]  }
   0x1   :  { %v23_v0 = vld [vmem:[%s240_s1 + $0x8] sm:$0xff]  ;;  %v22_v1 = vld [vmem:[%s240_s1] sm:$0xff]  ;;  %v68_v3 = vld [vmem:[%s242_s3 + $0x78] sm:$0xff] }
   0x2   :  { %46 = vmatpush.msra.mxu0 %v23_v0  ;;  %v21_v2 = vld [vmem:[%s239_s0] sm:$0xff]  ;;  %v67_v4 = vld [vmem:[%s242_s3 + $0x70] sm:$0xff]  ;;  %73 = vmatpush.msra.mxu1 %v68_v3  ;;  %v66_v5 = vld [vmem:[%s242_s3 + $0x68] sm:$0xff] }
   0x3   :  { %v65_v6 = vld [vmem:[%s242_s3 + $0x60] sm:$0xff] }
   0x4   :  { %47 = vmatpush.msra.mxu0 %v22_v1  ;;  %74 = vmatpush.msra.mxu1 %v67_v4 }
   0x5   :  { %112 = vmatmul.msk.f32.vlgmr.msra.gmra.mxu0 %vm28_vm0, %v21_v2 }
   0x6   :  { %75 = vmatpush.msra.mxu1 %v66_v5 }
   0x7   :  { %10 = vsyncpa [#allocation3], 0  ;;  %v64_v7 = vld [vmem:[%s242_s3 + $0x58] sm:$0xff]  ;;  %v63_v8 = vld [vmem:[%s242_s3 + $0x50] sm:$0xff]  ;;  %s142_s6 = smov [#allocation2]   ;;  %vm94_vm1 = vcmask 64512  }
   0x8   :  { %76 = vmatpush.msra.mxu1 %v65_v6  ;;  %v62_v9 = vld [vmem:[%s242_s3 + $0x48] sm:$0xff]  ;;  %v61_v10 = vld [vmem:[%s242_s3 + $0x40] sm:$0xff]  ;;  %v60_v11 = vld [vmem:[%s242_s3 + $0x38] sm:$0xff]  ;;  %s101_s7 = sshll.u32 %s142_s6, 4  ;;  %s102_s7 = int_to_ptr.vmem [resolvable:$true] %s101_s7 }
   0x9   :  { %v59_v12 = vld [vmem:[%s242_s3 + $0x30] sm:$0xff]  ;;  %v58_v13 = vld [vmem:[%s242_s3 + $0x28] sm:$0xff]  ;;  %v57_v14 = vld [vmem:[%s242_s3 + $0x20] sm:$0xff] }
   0xa   :  { %77 = vmatpush.msra.mxu1 %v64_v7  ;;  %v56_v15 = vld [vmem:[%s242_s3 + $0x18] sm:$0xff]  ;;  %v55_v16 = vld [vmem:[%s242_s3 + $0x10] sm:$0xff]  ;;  %v54_v17 = vld [vmem:[%s242_s3 + $0x8] sm:$0xff] }
   0xb   :  { %v53_v18 = vld [vmem:[%s242_s3] sm:$0xff]  ;;  %s103_s3 = sshll.u32 %s244_s5, 4  ;;  %s104_s3 = int_to_ptr.hbm [resolvable:$true] %s103_s3 }
   0xc   :  { %78 = vmatpush.msra.mxu1 %v63_v8  ;;  %v114_v19 = vld [vmem:[%s241_s2] ss:$0 sm:$0xff] }
   0xd   :  { %v115_v23 = vld [vmem:[%s243_s4] ss:$0 sm:$0xff] }
   0xe   :  { %79 = vmatpush.msra.mxu1 %v62_v9 }
  0x10   :  { %80 = vmatpush.msra.mxu1 %v61_v10 }
  0x12   :  { %81 = vmatpush.msra.mxu1 %v60_v11 }
  0x14   :  { %82 = vmatpush.msra.mxu1 %v59_v12 }
  0x16   :  { %83 = vmatpush.msra.mxu1 %v58_v13 }
  0x18   :  { %84 = vmatpush.msra.mxu1 %v57_v14 }
  0x1a   :  { %85 = vmatpush.msra.mxu1 %v56_v15 }
  0x1c   :  { %86 = vmatpush.msra.mxu1 %v55_v16 }
  0x1e   :  { %87 = vmatpush.msra.mxu1 %v54_v17 }
  0x20   :  { %88 = vmatpush.msra.mxu1 %v53_v18 }
  0x82   :  { %v49_v20 = vpop.f32.mrf.mxu0 }
  0x83   :  { %v50_v21 = vadd.f32 %v114_v19, %v49_v20 }
  0x85   :  { %v52_v22 = vmax.f32 %v50_v21, 0.0 }
  0x87   :  { %89 = vmatmul.f32.vlgmr.msra.gmra.mxu1 %v52_v22 }
 0x104   :  { %v90_v24 = vpop.f32.mrf.mxu1 }
 0x105   :  { %v91_v25 = vadd.f32 %v115_v23, %v90_v24 }
 0x107   :  { %v93_v26 = vmax.f32 %v91_v25, 0.0 }
 0x109   :  { %95 = vst.msk [vmem:[#allocation2] sm:$0xff] %vm94_vm1, %v93_v26 }
 0x10a   :  { %106 = dma.vmem_to_hbm [thread:$0]  %s102_s7, 128, %s104_s3, [#allocation3]  }
 0x10b   :  { %140 = dma.done.wait [#allocation3], 128  }
 0x10c   :  { %141 = vsyncadd [#allocation3], 4294967168 }
 0x10d   :  { %111 = vsyncpa [#allocation3], 1 }

</bundles_post_ra>
